<compile_context>
chip_gen: v6e
topology: v6e:2x2x1
jax: 0.10.0
libtpu: 0.0.40
codegen_flags: <defaults>
</compile_context>

<pallas_src>
import functools

import jax
import jax.numpy as jnp
from jax.experimental import pallas as pl
from jax.experimental.pallas import tpu as pltpu


# ----------------------------------------------------------------------------
# Pass 1: per-voxel quaternion rotation -> flat scatter target (int32)
# ----------------------------------------------------------------------------
def _rotate_coords_kernel(q_ref, *args, W, HW, src_rows, lane_tile, bound,
                          sentinel, pow2_w):
    """Grid = (src_tiles, lane_chunks); purely elementwise, runs once per voxel."""
    if pow2_w:
        x_ref, tgt_ref = args
    else:
        cj_ref, ck_ref, x_ref, tgt_ref = args

    s = pl.program_id(0)
    c = pl.program_id(1)

    # quaternion components (SMEM scalars)
    qw = q_ref[0]
    qx = q_ref[1]
    qy = q_ref[2]
    qz = q_ref[3]

    # integer voxel coordinates of this (src_rows, lane_tile) tile
    ci = (s * src_rows
          + jax.lax.broadcasted_iota(jnp.int32, (src_rows, lane_tile), 0)
          ).astype(jnp.float32)                                  # depth coord
    if pow2_w:
        p = (c * lane_tile
             + jax.lax.broadcasted_iota(jnp.int32, (src_rows, lane_tile), 1))
        shift = W.bit_length() - 1                               # log2(W)
        cj = jnp.right_shift(p, shift).astype(jnp.float32)       # p // W
        ck = jnp.bitwise_and(p, W - 1).astype(jnp.float32)       # p %  W
    else:
        cj = cj_ref[...]                                         # (1, lane_tile)
        ck = ck_ref[...]                                         # (1, lane_tile)

    # p = q * (0, c)        (term ordering identical to the PyTorch module)
    pw = -(qx * ci) - qy * cj - qz * ck
    px = qw * ci + qy * ck - qz * cj
    py = qw * cj + qz * ci - qx * ck
    pz = qw * ck + qx * cj - qy * ci
    # r = p * conj(q), keep the vector part
    rx = -(pw * qx) + px * qw - py * qz + pz * qy
    ry = -(pw * qy) + py * qw - pz * qx + px * qz
    rz = -(pw * qz) + pz * qw - px * qy + py * qx

    # torch .long() == truncation toward zero
    ri = rx.astype(jnp.int32)
    rj = ry.astype(jnp.int32)
    rk = rz.astype(jnp.int32)

    # NOTE: PyTorch checks every axis against x.shape[1] (== H); kept faithful
    # (only geometrically meaningful for cubic volumes; non-cubic volumes with
    # H > D would raise in PyTorch and are silently dropped here).
    in_b = ((ri >= 0) & (ri < bound) & (rj >= 0) & (rj < bound)
            & (rk >= 0) & (rk < bound))
    valid = (x_ref[...] != 0) & in_b
    tgt_ref[...] = jnp.where(valid, ri * HW + rj * W + rk, sentinel)


# ----------------------------------------------------------------------------
# Pass 2: one-hot MXU scatter into the flat lane-dense output view
# ----------------------------------------------------------------------------
def _scatter_kernel(flags_ref, tgt_ref, o_ref, acc_ref, *, out_rows, src_rows,
                    lane_tile, n_chunks, unroll):
    """Grid = (out_tiles, src_tiles, lane_chunks); axes 1,2 are the reduction."""
    o = pl.program_id(0)
    s = pl.program_id(1)
    c = pl.program_id(2)

    @pl.when((s == 0) & (c == 0))
    def _init():
        acc_ref[...] = jnp.zeros_like(acc_ref)

    flag = flags_ref[s * n_chunks + c]

    @pl.when(flag != 0)
    def _scatter():
        out_row0 = o * out_rows
        row_iota = out_row0 + jax.lax.broadcasted_iota(
            jnp.int32, (out_rows, lane_tile), 0)
        lane_iota = jax.lax.broadcasted_iota(jnp.int32, (128, lane_tile), 0)
        one = jnp.ones((), jnp.bfloat16)
        zero = jnp.zeros((), jnp.bfloat16)

        def body(r, acc):
            t = tgt_ref[pl.ds(r, 1), :]                  # (1, lane_tile) int32
            t_row = jnp.right_shift(t, 7)                # flat_idx // 128
            t_lane = jnp.bitwise_and(t, 127)             # flat_idx %  128
            # bf16 one-hots: 0/1 exact, half the vst/vld traffic of f32
            rowmatch = jnp.where(row_iota == t_row, one, zero)    # (out_rows, lane_tile)
            lanematch = jnp.where(lane_iota == t_lane, one, zero)  # (128, lane_tile)
            cnt = jax.lax.dot_general(
                rowmatch, lanematch,
                dimension_numbers=(((1,), (1,)), ((), ())),
                preferred_element_type=jnp.float32)               # (out_rows, 128)
            # max-accumulate keeps values <= lane_tile (exact in f32) and makes
            # the final `> 0` test overflow-proof.
            return jnp.maximum(acc, cnt)

        acc_ref[...] = jax.lax.fori_loop(0, src_rows, body, acc_ref[...],
                                         unroll=unroll)

    @pl.when((s == pl.num_programs(1) - 1) & (c == pl.num_programs(2) - 1))
    def _finalize():
        o_ref[...] = (acc_ref[...] > 0.0).astype(o_ref.dtype)


# ----------------------------------------------------------------------------
# Wrapper
# ----------------------------------------------------------------------------
def quaternion_rotation(x, axis, theta, *, training=True, src_rows=16,
                        out_rows=128, lane_tile=2048):
    """Pallas equivalent of QuaternionRotation.forward."""
    if not training:
        return x

    D, H, W = x.shape
    HW = H * W
    N = D * HW

    # TODO(synk): pad the (H*W) plane up to a multiple of 128 lanes for volumes
    # whose plane size is not already lane aligned.
    assert HW % 128 == 0, "H*W must be a multiple of 128"

    # ---- tiling ------------------------------------------------------------
    src_rows = max(8, min(src_rows, pl.cdiv(D, 8) * 8))
    d_pad = pl.cdiv(D, src_rows) * src_rows

    lane_tile = max(128, (min(lane_tile, HW) // 128) * 128)
    while HW % lane_tile != 0:        # 128 always divides HW -> terminates
        lane_tile -= 128
    n_chunks = HW // lane_tile
    n_src = d_pad // src_rows

    r_out = N // 128                  # flat lane-dense output rows
    out_rows = max(8, min(out_rows, pl.cdiv(r_out, 8) * 8))
    r_pad = pl.cdiv(r_out, out_rows) * out_rows
    n_out = r_pad // out_rows
    sentinel = r_pad * 128            # flat index that never matches a row

    pow2_w = (W & (W - 1)) == 0

    # ---- axis-angle -> quaternion (matches _axis_angle_to_quaternion) ------
    sin_half = jnp.sin(theta / 2.0)
    cos_half = jnp.cos(theta / 2.0)
    q = jnp.concatenate(
        [jnp.reshape(cos_half, (1,)),
         jnp.asarray(axis, jnp.float32) * sin_half]).astype(jnp.float32)

    # ---- lane-dense source view (D, H*W), depth padded to the tile size ----
    x2 = x.reshape(D, HW)
    if d_pad != D:
        x2 = jnp.pad(x2, ((0, d_pad - D), (0, 0)))

    # per-(src-tile, lane-chunk) nonzero flags: skip empty tiles in pass 2
    flags = (x2.reshape(n_src, src_rows, n_chunks, lane_tile) != 0).any(
        axis=(1, 3)).reshape(-1).astype(jnp.int32)

    # in-plane coordinate rows only needed when W is not a power of two
    coord_inputs = []
    coord_specs = []
    if not pow2_w:
        pcol = jnp.arange(HW, dtype=jnp.int32)
        coord_inputs = [(pcol // W).astype(jnp.float32).reshape(1, HW),
                        (pcol % W).astype(jnp.float32).reshape(1, HW)]
        coord_specs = [pl.BlockSpec((1, lane_tile), lambda s, c: (0, c)),
                       pl.BlockSpec((1, lane_tile), lambda s, c: (0, c))]

    # ---- pass 1: rotate all voxel coords -> flat scatter targets -----------
    tgt = pl.pallas_call(
        functools.partial(_rotate_coords_kernel, W=W, HW=HW, src_rows=src_rows,
                          lane_tile=lane_tile, bound=H, sentinel=sentinel,
                          pow2_w=pow2_w),
        out_shape=jax.ShapeDtypeStruct((d_pad, HW), jnp.int32),
        grid=(n_src, n_chunks),
        in_specs=([pl.BlockSpec(memory_space=pltpu.MemorySpace.SMEM)]  # q (4,)
                  + coord_specs
                  + [pl.BlockSpec((src_rows, lane_tile), lambda s, c: (s, c))]),
        out_specs=pl.BlockSpec((src_rows, lane_tile), lambda s, c: (s, c)),
        compiler_params=pltpu.CompilerParams(
            dimension_semantics=("parallel", "parallel")),
    )(q, *coord_inputs, x2)

    # ---- pass 2: one-hot MXU scatter into the flat (r_pad, 128) output -----
    unroll = src_rows <= 8
    out2 = pl.pallas_call(
        functools.partial(_scatter_kernel, out_rows=out_rows, src_rows=src_rows,
                          lane_tile=lane_tile, n_chunks=n_chunks, unroll=unroll),
        out_shape=jax.ShapeDtypeStruct((r_pad, 128), x.dtype),
        grid=(n_out, n_src, n_chunks),
        in_specs=[
            pl.BlockSpec(memory_space=pltpu.MemorySpace.SMEM),            # flags
            pl.BlockSpec((src_rows, lane_tile), lambda o, s, c: (s, c)),  # tgt tile
        ],
        out_specs=pl.BlockSpec((out_rows, 128), lambda o, s, c: (o, 0)),
        scratch_shapes=[pltpu.VMEM((out_rows, 128), jnp.float32)],
        compiler_params=pltpu.CompilerParams(
            dimension_semantics=("parallel", "arbitrary", "arbitrary")),
    )(flags, tgt)

    return out2.reshape(-1)[:N].reshape(D, H, W)


# ----------------------------------------------------------------------------
# Pure-JAX reference with identical math/ordering (for verification)
# ----------------------------------------------------------------------------
def quaternion_rotation_ref(x, axis, theta):
    D, H, W = x.shape
    N = D * H * W
    sin_half = jnp.sin(theta / 2.0)
    cos_half = jnp.cos(theta / 2.0)
    q = jnp.concatenate(
        [jnp.reshape(cos_half, (1,)),
         jnp.asarray(axis, jnp.float32) * sin_half]).astype(jnp.float32)
    qw, qx, qy, qz = q[0], q[1], q[2], q[3]

    lin = jnp.arange(N, dtype=jnp.int32)
    ci = (lin // (H * W)).astype(jnp.float32)
    cj = ((lin // W) % H).astype(jnp.float32)
    ck = (lin % W).astype(jnp.float32)

    pw = -(qx * ci) - qy * cj - qz * ck
    px = qw * ci + qy * ck - qz * cj
    py = qw * cj + qz * ci - qx * ck
    pz = qw * ck + qx * cj - qy * ci
    rx = -(pw * qx) + px * qw - py * qz + pz * qy
    ry = -(pw * qy) + py * qw - pz * qx + px * qz
    rz = -(pw * qz) + pz * qw - px * qy + py * qx

    ri, rj, rk = rx.astype(jnp.int32), ry.astype(jnp.int32), rz.astype(jnp.int32)
    bound = x.shape[1]
    in_b = ((ri >= 0) & (ri < bound) & (rj >= 0) & (rj < bound)
            & (rk >= 0) & (rk < bound))
    valid = (x.reshape(-1) != 0.0) & in_b
    tgt = jnp.where(valid, ri * (H * W) + rj * W + rk, N)   # dump slot for invalid
    out = jnp.zeros((N + 1,), x.dtype).at[tgt].max(valid.astype(x.dtype))
    return out[:N].reshape(D, H, W)


if __name__ == "__main__":
    key = jax.random.PRNGKey(0)
    D = H = W = 16
    # sparse binary voxel grid
    x = (jax.random.uniform(key, (D, H, W)) > 0.7).astype(jnp.float32)

    # Generic (non-axis-aligned) rotation avoids the knife-edge case where the
    # true rotated coordinates are exact integers and float truncation becomes
    # compiler-dependent.
    axis = jnp.array([0.283, 0.572, 0.771], dtype=jnp.float32)
    axis = axis / jnp.sqrt(jnp.sum(axis * axis))
    theta = jnp.array(0.9, dtype=jnp.float32)

    out = jax.block_until_ready(quaternion_rotation(x, axis, theta, training=True))
    assert out.shape == x.shape and out.dtype == x.dtype

    ref = quaternion_rotation_ref(x, axis, theta)
    mismatches = int(jnp.sum(out != ref))
    # Voxels landing within a few ULP of an integer boundary may flip between
    # Mosaic and XLA compilations; with a generic axis/angle this set is empty.
    assert mismatches <= 8, f"mismatched voxels: {mismatches} / {out.size}"

    # Lane-chunked / multi-output-tile / unrolled-loop configuration must agree.
    out_chunk = jax.block_until_ready(
        quaternion_rotation(x, axis, theta, training=True,
                            src_rows=8, out_rows=8, lane_tile=128))
    mismatches_c = int(jnp.sum(out_chunk != ref))
    assert mismatches_c <= 8, f"chunked mismatches: {mismatches_c} / {out.size}"

    # exact check: zero rotation must reproduce the input bit-exactly
    out_id = jax.block_until_ready(
        quaternion_rotation(x, axis, jnp.float32(0.0), training=True))
    assert bool(jnp.all(out_id == x)), "identity rotation mismatch"

    # eval mode: pass-through
    out_eval = quaternion_rotation(x, axis, theta, training=False)
    assert bool(jnp.all(out_eval == x))

    print("KERNEL_OK")
</pallas_src>

<mosaic_0001>
module attributes {stable_mosaic.version = 11 : i64} {
  func.func @_rotate_coords_kernel(%arg0: i32, %arg1: i32, %arg2: memref<4xf32, #tpu.memory_space<smem>>, %arg3: memref<16x256xf32, #tpu.memory_space<vmem>>, %arg4: memref<16x256xi32, #tpu.memory_space<vmem>>) attributes {dimension_semantics = [#tpu.dimension_semantics<parallel>, #tpu.dimension_semantics<parallel>], iteration_bounds = array<i64: 1, 1>, scalar_prefetch = 0 : i64, scratch_operands = 0 : i64, tpu.core_type = #tpu.core_type<tc>, window_params = [{transform_indices = @transform_0, window_bounds = array<i64: 4>}, {transform_indices = @transform_1, window_bounds = array<i64: 16, 256>}, {transform_indices = @transform_2, window_bounds = array<i64: 16, 256>}]} {
    %c0 = arith.constant 0 : index
    %0 = memref.load %arg2[%c0] : memref<4xf32, #tpu.memory_space<smem>>
    %c1 = arith.constant 1 : index
    %1 = memref.load %arg2[%c1] : memref<4xf32, #tpu.memory_space<smem>>
    %c2 = arith.constant 2 : index
    %2 = memref.load %arg2[%c2] : memref<4xf32, #tpu.memory_space<smem>>
    %c3 = arith.constant 3 : index
    %3 = memref.load %arg2[%c3] : memref<4xf32, #tpu.memory_space<smem>>
    %c16_i32 = arith.constant 16 : i32
    %4 = arith.muli %arg0, %c16_i32 : i32
    %5 = tpu.iota {dimensions = array<i32: 0>} : vector<16x256xi32>
    %6 = vector.broadcast %4 : i32 to vector<16x256xi32>
    %7 = arith.addi %6, %5 : vector<16x256xi32>
    %8 = arith.sitofp %7 : vector<16x256xi32> to vector<16x256xf32>
    %c256_i32 = arith.constant 256 : i32
    %9 = arith.muli %arg1, %c256_i32 : i32
    %10 = tpu.iota {dimensions = array<i32: 1>} : vector<16x256xi32>
    %11 = vector.broadcast %9 : i32 to vector<16x256xi32>
    %12 = arith.addi %11, %10 : vector<16x256xi32>
    %c4_i32 = arith.constant 4 : i32
    %13 = vector.broadcast %c4_i32 : i32 to vector<16x256xi32>
    %14 = arith.shrsi %12, %13 : vector<16x256xi32>
    %15 = arith.sitofp %14 : vector<16x256xi32> to vector<16x256xf32>
    %c15_i32 = arith.constant 15 : i32
    %16 = vector.broadcast %c15_i32 : i32 to vector<16x256xi32>
    %17 = arith.andi %12, %16 : vector<16x256xi32>
    %18 = arith.sitofp %17 : vector<16x256xi32> to vector<16x256xf32>
    %19 = vector.broadcast %1 : f32 to vector<16x256xf32>
    %20 = arith.mulf %19, %8 : vector<16x256xf32>
    %cst = arith.constant 0.000000e+00 : f32
    %21 = vector.broadcast %cst : f32 to vector<16x256xf32>
    %22 = arith.subf %21, %20 : vector<16x256xf32>
    %23 = vector.broadcast %2 : f32 to vector<16x256xf32>
    %24 = arith.mulf %23, %15 : vector<16x256xf32>
    %25 = arith.subf %22, %24 : vector<16x256xf32>
    %26 = vector.broadcast %3 : f32 to vector<16x256xf32>
    %27 = arith.mulf %26, %18 : vector<16x256xf32>
    %28 = arith.subf %25, %27 : vector<16x256xf32>
    %29 = vector.broadcast %0 : f32 to vector<16x256xf32>
    %30 = arith.mulf %29, %8 : vector<16x256xf32>
    %31 = vector.broadcast %2 : f32 to vector<16x256xf32>
    %32 = arith.mulf %31, %18 : vector<16x256xf32>
    %33 = arith.addf %30, %32 : vector<16x256xf32>
    %34 = vector.broadcast %3 : f32 to vector<16x256xf32>
    %35 = arith.mulf %34, %15 : vector<16x256xf32>
    %36 = arith.subf %33, %35 : vector<16x256xf32>
    %37 = vector.broadcast %0 : f32 to vector<16x256xf32>
    %38 = arith.mulf %37, %15 : vector<16x256xf32>
    %39 = vector.broadcast %3 : f32 to vector<16x256xf32>
    %40 = arith.mulf %39, %8 : vector<16x256xf32>
    %41 = arith.addf %38, %40 : vector<16x256xf32>
    %42 = vector.broadcast %1 : f32 to vector<16x256xf32>
    %43 = arith.mulf %42, %18 : vector<16x256xf32>
    %44 = arith.subf %41, %43 : vector<16x256xf32>
    %45 = vector.broadcast %0 : f32 to vector<16x256xf32>
    %46 = arith.mulf %45, %18 : vector<16x256xf32>
    %47 = vector.broadcast %1 : f32 to vector<16x256xf32>
    %48 = arith.mulf %47, %15 : vector<16x256xf32>
    %49 = arith.addf %46, %48 : vector<16x256xf32>
    %50 = vector.broadcast %2 : f32 to vector<16x256xf32>
    %51 = arith.mulf %50, %8 : vector<16x256xf32>
    %52 = arith.subf %49, %51 : vector<16x256xf32>
    %53 = vector.broadcast %1 : f32 to vector<16x256xf32>
    %54 = arith.mulf %28, %53 : vector<16x256xf32>
    %cst_0 = arith.constant 0.000000e+00 : f32
    %55 = vector.broadcast %cst_0 : f32 to vector<16x256xf32>
    %56 = arith.subf %55, %54 : vector<16x256xf32>
    %57 = vector.broadcast %0 : f32 to vector<16x256xf32>
    %58 = arith.mulf %36, %57 : vector<16x256xf32>
    %59 = arith.addf %56, %58 : vector<16x256xf32>
    %60 = vector.broadcast %3 : f32 to vector<16x256xf32>
    %61 = arith.mulf %44, %60 : vector<16x256xf32>
    %62 = arith.subf %59, %61 : vector<16x256xf32>
    %63 = vector.broadcast %2 : f32 to vector<16x256xf32>
    %64 = arith.mulf %52, %63 : vector<16x256xf32>
    %65 = arith.addf %62, %64 : vector<16x256xf32>
    %66 = vector.broadcast %2 : f32 to vector<16x256xf32>
    %67 = arith.mulf %28, %66 : vector<16x256xf32>
    %cst_1 = arith.constant 0.000000e+00 : f32
    %68 = vector.broadcast %cst_1 : f32 to vector<16x256xf32>
    %69 = arith.subf %68, %67 : vector<16x256xf32>
    %70 = vector.broadcast %0 : f32 to vector<16x256xf32>
    %71 = arith.mulf %44, %70 : vector<16x256xf32>
    %72 = arith.addf %69, %71 : vector<16x256xf32>
    %73 = vector.broadcast %1 : f32 to vector<16x256xf32>
    %74 = arith.mulf %52, %73 : vector<16x256xf32>
    %75 = arith.subf %72, %74 : vector<16x256xf32>
    %76 = vector.broadcast %3 : f32 to vector<16x256xf32>
    %77 = arith.mulf %36, %76 : vector<16x256xf32>
    %78 = arith.addf %75, %77 : vector<16x256xf32>
    %79 = vector.broadcast %3 : f32 to vector<16x256xf32>
    %80 = arith.mulf %28, %79 : vector<16x256xf32>
    %cst_2 = arith.constant 0.000000e+00 : f32
    %81 = vector.broadcast %cst_2 : f32 to vector<16x256xf32>
    %82 = arith.subf %81, %80 : vector<16x256xf32>
    %83 = vector.broadcast %0 : f32 to vector<16x256xf32>
    %84 = arith.mulf %52, %83 : vector<16x256xf32>
    %85 = arith.addf %82, %84 : vector<16x256xf32>
    %86 = vector.broadcast %2 : f32 to vector<16x256xf32>
    %87 = arith.mulf %36, %86 : vector<16x256xf32>
    %88 = arith.subf %85, %87 : vector<16x256xf32>
    %89 = vector.broadcast %1 : f32 to vector<16x256xf32>
    %90 = arith.mulf %44, %89 : vector<16x256xf32>
    %91 = arith.addf %88, %90 : vector<16x256xf32>
    %92 = arith.fptosi %65 : vector<16x256xf32> to vector<16x256xi32>
    %93 = arith.fptosi %78 : vector<16x256xf32> to vector<16x256xi32>
    %94 = arith.fptosi %91 : vector<16x256xf32> to vector<16x256xi32>
    %c0_i32 = arith.constant 0 : i32
    %95 = vector.broadcast %c0_i32 : i32 to vector<16x256xi32>
    %96 = arith.cmpi sge, %92, %95 : vector<16x256xi32>
    %c16_i32_3 = arith.constant 16 : i32
    %97 = vector.broadcast %c16_i32_3 : i32 to vector<16x256xi32>
    %98 = arith.cmpi slt, %92, %97 : vector<16x256xi32>
    %99 = arith.andi %96, %98 : vector<16x256xi1>
    %c0_i32_4 = arith.constant 0 : i32
    %100 = vector.broadcast %c0_i32_4 : i32 to vector<16x256xi32>
    %101 = arith.cmpi sge, %93, %100 : vector<16x256xi32>
    %102 = arith.andi %99, %101 : vector<16x256xi1>
    %c16_i32_5 = arith.constant 16 : i32
    %103 = vector.broadcast %c16_i32_5 : i32 to vector<16x256xi32>
    %104 = arith.cmpi slt, %93, %103 : vector<16x256xi32>
    %105 = arith.andi %102, %104 : vector<16x256xi1>
    %c0_i32_6 = arith.constant 0 : i32
    %106 = vector.broadcast %c0_i32_6 : i32 to vector<16x256xi32>
    %107 = arith.cmpi sge, %94, %106 : vector<16x256xi32>
    %108 = arith.andi %105, %107 : vector<16x256xi1>
    %c16_i32_7 = arith.constant 16 : i32
    %109 = vector.broadcast %c16_i32_7 : i32 to vector<16x256xi32>
    %110 = arith.cmpi slt, %94, %109 : vector<16x256xi32>
    %111 = arith.andi %108, %110 : vector<16x256xi1>
    %c0_8 = arith.constant 0 : index
    %c0_9 = arith.constant 0 : index
    %112 = vector.load %arg3[%c0_8, %c0_9] : memref<16x256xf32, #tpu.memory_space<vmem>>, vector<16x256xf32>
    %cst_10 = arith.constant 0.000000e+00 : f32
    %113 = vector.broadcast %cst_10 : f32 to vector<16x256xf32>
    %114 = arith.cmpf one, %112, %113 : vector<16x256xf32>
    %115 = arith.andi %114, %111 : vector<16x256xi1>
    %c256_i32_11 = arith.constant 256 : i32
    %116 = vector.broadcast %c256_i32_11 : i32 to vector<16x256xi32>
    %117 = arith.muli %92, %116 : vector<16x256xi32>
    %c16_i32_12 = arith.constant 16 : i32
    %118 = vector.broadcast %c16_i32_12 : i32 to vector<16x256xi32>
    %119 = arith.muli %93, %118 : vector<16x256xi32>
    %120 = arith.addi %117, %119 : vector<16x256xi32>
    %121 = arith.addi %120, %94 : vector<16x256xi32>
    %c4096_i32 = arith.constant 4096 : i32
    %122 = vector.broadcast %c4096_i32 : i32 to vector<16x256xi32>
    %123 = arith.select %115, %121, %122 : vector<16x256xi1>, vector<16x256xi32>
    %c0_13 = arith.constant 0 : index
    %c0_14 = arith.constant 0 : index
    %124 = vector.load %arg4[%c0_13, %c0_14] : memref<16x256xi32, #tpu.memory_space<vmem>>, vector<16x256xi32>
    tpu.vector_store %arg4[%c0_13, %c0_14], %123 {strides = array<i32>} : memref<16x256xi32, #tpu.memory_space<vmem>>, vector<16x256xi32>,
    return
  }
  func.func @transform_0(%arg0: i32, %arg1: i32) -> i32 {
    %c0_i32 = arith.constant 0 : i32
    %c0_i32_0 = arith.constant 0 : i32
    return %c0_i32 : i32
  }
  func.func @transform_1(%arg0: i32, %arg1: i32) -> (i32, i32) {
    %c0_i32 = arith.constant 0 : i32
    return %arg0, %arg1 : i32, i32
  }
  func.func @transform_2(%arg0: i32, %arg1: i32) -> (i32, i32) {
    %c0_i32 = arith.constant 0 : i32
    return %arg0, %arg1 : i32, i32
  }
}

</mosaic_0001>

<bundles_post_ra>
// kernel: tpu_custom_call.1
= control target key start
LH: loop header
LB: loop body
LE: loop exit
PB: predicated region body
PF: predicated region fallthrough
CT: control target
= control target key end

     0   :  { %7 = vsyncpa [#allocation5], 0  ;;  %s605_s0 = inlined_call_operand.hbm [shape: f32[4], index: 0, kind: input, shape index: {}]   ;;  %s606_s1 = inlined_call_operand.hbm [shape: f32[16,256], index: 1, kind: input, shape index: {}]   ;;  %s607_s2 = inlined_call_operand.hbm [shape: s32[16,256], index: 2, kind: output, shape index: {}]  }
   0x1   :  { %8 = vsyncpa [#allocation3], 0 }
   0x2   :  { %9 = vsyncpa [#allocation4], 0  ;;  %s417_s9 = smov [#allocation2]   ;;  %s418_s12 = smov [#allocation6]  }
   0x3   :  { %17 = dma.hbm_to_smem %s605_s0, 16, %s417_s9, [#allocation5]  }
   0x4   :  { %s23_s13 = sshll.u32 %s418_s12, 4  ;;  %s24_s13 = int_to_ptr.vmem [resolvable:$true] %s23_s13 }
   0x5   :  { %s379_s14 = scalar_lea.vmem %s24_s13, 512  ;;  %p384_p1 = scmp.lt.s32.totalorder %s24_s13, %s24_s13 }
   0x6   :  { %p380_p0 = scmp.ne.s32.totalorder %s24_s13, %s379_s14  ;;  %p385_p2 = scmp.lt.s32.totalorder %s379_s14, %s379_s14 }
   0x8   :  { %p386_p3 = por %p385_p2, %p384_p1 }
   0xa   :  { %p387_p4 = pnand %p386_p3, %p380_p0 }
   0xc   :  { %390 = shalt.err (!%p387_p4)
}
   0xd   :  { %s419_s15 = smov 256   ;;  %s420_s16 = smov 16  }
   0xe   :  { %29 = dma.hbm_to_vmem [thread:$0]  %s606_s1, 512, %s24_s13, [#allocation3], %s419_s15, %s419_s15, %s420_s16  }
   0xf   :  { %411 = dma.done.wait [#allocation5], 16  }
  0x10   :  { %412 = vsyncadd [#allocation5], 4294967280 }
  0x11   :  { %413 = dma.done.wait [#allocation3], 512  }
  0x12   :  { %414 = vsyncadd [#allocation3], 4294966784 }
  0x13   :  { %36 = sfence }
  0x14   :  { %s37_s0 = sld [smem:[#allocation2]]  ;;  %v42_v0 = vlaneseq  ;;  %s421_s1 = smov [#allocation7]  }
  0x15   :  { %s331_s19 = sld [smem:[#allocation2 + $0x1]]  ;;  %s318_s22 = sshll.u32 %s421_s1, 4  ;;  %s319_s22 = int_to_ptr.vmem [resolvable:$true] %s318_s22 }
  0x16   :  { %s332_s20 = sld [smem:[#allocation2 + $0x2]]  ;;  %v43_v1 = vshrl.u32 %v42_v0, 7  ;;  %v52_v2 = vand.u32 127, %v42_v0  ;;  %s391_s23 = scalar_lea.vmem %s319_s22, 512 }
  0x17   :  { %s333_s21 = sld [smem:[#allocation2 + $0x3]]  ;;  %p392_p5 = scmp.ne.s32.totalorder %s319_s22, %s391_s23 }
  0x18   :  { %v48_v3 = vcvt.s32.f32 %v43_v1  ;;  %v57_v4 = vshra.s32 %v52_v2, 4  ;;  %v61_v5 = vand.u32 15, %v52_v2  ;;  %v53_v6 = vadd.s32 128, %v52_v2  ;;  %p396_p6 = scmp.lt.s32.totalorder %s319_s22, %s319_s22  ;;  %p397_p7 = scmp.lt.s32.totalorder %s391_s23, %s391_s23 }
  0x19   :  { %v44_v7 = vadd.s32 8, %v43_v1 }
  0x1a   :  { %v59_v8 = vcvt.s32.f32 %v57_v4  ;;  %v63_v9 = vcvt.s32.f32 %v61_v5  ;;  %v446_v10 = vstv %s37_s0  ;;  %v58_v11 = vshra.s32 %v53_v6, 4  ;;  %p398_p8 = por %p397_p7, %p396_p6 }
  0x1b   :  { %v448_v12 = vstv %s331_s19  ;;  %v85_v13 = vmul.f32 %v446_v10, %v48_v3  ;;  %v62_v14 = vand.u32 15, %v53_v6  ;;  %v451_v15 = vcvt.s32.f32 %v44_v7 }
  0x1c   :  { %v66_v16 = vmul.f32 %v448_v12, %v48_v3  ;;  %v454_v17 = vstv %s332_s20  ;;  %v457_v18 = vmul.f32 %v446_v10, %v59_v8  ;;  %v460_v19 = vmul.f32 %v448_v12, %v63_v9  ;;  %p399_p9 = pnand %p398_p8, %p392_p5 }
  0x1d   :  { %v463_v20 = vmul.f32 %v454_v17, %v59_v8  ;;  %v465_v21 = vstv %s333_s21  ;;  %v468_v22 = vmul.f32 %v454_v17, %v63_v9  ;;  %v113_v23 = vmul.f32 %v446_v10, %v63_v9 }
  0x1e   :  { %v68_v24 = vsub.f32 0.0, %v66_v16  ;;  %v472_v25 = vmul.f32 %v465_v21, %v63_v9  ;;  %v475_v26 = vmul.f32 %v465_v21, %v59_v8  ;;  %v101_v27 = vmul.f32 %v465_v21, %v48_v3 }
  0x1f   :  { %v89_v28 = vadd.f32 %v468_v22, %v85_v13  ;;  %v115_v29 = vmul.f32 %v448_v12, %v59_v8  ;;  %v119_v30 = vmul.f32 %v454_v17, %v48_v3  ;;  %v60_v31 = vcvt.s32.f32 %v58_v11  ;;  %v277_v11 = vld [vmem:[#allocation6] sm:$0xff] }
  0x20   :  { %v73_v32 = vsub.f32 %v68_v24, %v463_v20  ;;  %v103_v33 = vadd.f32 %v101_v27, %v457_v18  ;;  %v64_v34 = vcvt.s32.f32 %v62_v14  ;;  %v485_v35 = vmul.f32 %v448_v12, %v451_v15 }
  0x21   :  { %v95_v36 = vsub.f32 %v89_v28, %v475_v26  ;;  %v488_v37 = vadd.f32 %v115_v29, %v113_v23  ;;  %v491_v38 = vmul.f32 %v454_v17, %v60_v31  ;;  %v494_v39 = vmul.f32 %v465_v21, %v60_v31 }
  0x22   :  { %v80_v40 = vsub.f32 %v73_v32, %v472_v25  ;;  %v109_v41 = vsub.f32 %v103_v33, %v460_v19  ;;  %v499_v42 = vmul.f32 %v465_v21, %v64_v34  ;;  %v502_v43 = vmul.f32 %v454_v17, %v64_v34 }
  0x23   :  { %v121_v44 = vsub.f32 %v488_v37, %v119_v30  ;;  %v133_v45 = vmul.f32 %v95_v36, %v446_v10  ;;  %v181_v46 = vmul.f32 %v95_v36, %v465_v21  ;;  %v205_v47 = vmul.f32 %v95_v36, %v454_v17 }
  0x24   :  { %v125_v48 = vmul.f32 %v80_v40, %v448_v12  ;;  %v141_v49 = vmul.f32 %v109_v41, %v465_v21  ;;  %v157_v50 = vmul.f32 %v80_v40, %v454_v17  ;;  %v165_v51 = vmul.f32 %v109_v41, %v446_v10 }
  0x25   :  { %v149_v52 = vmul.f32 %v121_v44, %v454_v17  ;;  %v173_v53 = vmul.f32 %v121_v44, %v448_v12  ;;  %v189_v54 = vmul.f32 %v80_v40, %v465_v21  ;;  %v197_v55 = vmul.f32 %v121_v44, %v446_v10 }
  0x26   :  { %v129_v56 = vsub.f32 0.0, %v125_v48  ;;  %v161_v57 = vsub.f32 0.0, %v157_v50  ;;  %v213_v58 = vmul.f32 %v109_v41, %v448_v12  ;;  %v74_v59 = vsub.f32 %v68_v24, %v491_v38 }
  0x27   :  { %v193_v60 = vsub.f32 0.0, %v189_v54  ;;  %v90_v61 = vadd.f32 %v502_v43, %v85_v13  ;;  %v520_v62 = vmul.f32 %v446_v10, %v60_v31  ;;  %v523_v63 = vmul.f32 %v448_v12, %v64_v34 }
  0x28   :  { %v137_v0 = vadd.f32 %v133_v45, %v129_v56  ;;  %v169_v1 = vadd.f32 %v165_v51, %v161_v57  ;;  %v81_v2 = vsub.f32 %v74_v59, %v499_v42  ;;  %v114_v3 = vmul.f32 %v446_v10, %v64_v34 }
  0x29   :  { %v201_v4 = vadd.f32 %v197_v55, %v193_v60  ;;  %v96_v5 = vsub.f32 %v90_v61, %v494_v39  ;;  %v104_v6 = vadd.f32 %v101_v27, %v520_v62  ;;  %v116_v7 = vmul.f32 %v448_v12, %v60_v31 }
  0x2a   :  { %v145_v8 = vsub.f32 %v137_v0, %v141_v49  ;;  %v177_v9 = vsub.f32 %v169_v1, %v173_v53  ;;  %v126_v13 = vmul.f32 %v81_v2, %v448_v12  ;;  %v158_v14 = vmul.f32 %v81_v2, %v454_v17 }
  0x2b   :  { %v209_v16 = vsub.f32 %v201_v4, %v205_v47  ;;  %v110_v23 = vsub.f32 %v104_v6, %v523_v63  ;;  %v533_v24 = vadd.f32 %v116_v7, %v114_v3  ;;  %v134_v28 = vmul.f32 %v96_v5, %v446_v10  ;;  %v546_v3 = vld [vmem:[#allocation6 + $0x8] sm:$0xff] }
  0x2c   :  { %v153_v29 = vadd.f32 %v149_v52, %v145_v8  ;;  %v185_v32 = vadd.f32 %v181_v46, %v177_v9  ;;  %v130_v33 = vsub.f32 0.0, %v126_v13  ;;  %v162_v27 = vsub.f32 0.0, %v158_v14 }
  0x2d   :  { %v217_v34 = vadd.f32 %v213_v58, %v209_v16  ;;  %vm281_vm0 = vcmp.ne.f32.partialorder %v277_v11, 0.0  ;;  %v122_v31 = vsub.f32 %v533_v24, %v119_v30  ;;  %v142_v36 = vmul.f32 %v110_v23, %v465_v21 }
  0x2e   :  { %v166_v40 = vmul.f32 %v110_v23, %v446_v10  ;;  %v334_v41 = vtrunc.f32 %v153_v29  ;;  %v342_v44 = vtrunc.f32 %v185_v32  ;;  %v138_v45 = vadd.f32 %v134_v28, %v130_v33 }
  0x2f   :  { %v182_v47 = vmul.f32 %v96_v5, %v465_v21  ;;  %v350_v48 = vtrunc.f32 %v217_v34  ;;  %v150_v49 = vmul.f32 %v122_v31, %v454_v17  ;;  %v174_v46 = vmul.f32 %v122_v31, %v448_v12 }
  0x30   :  { %v170_v50 = vadd.f32 %v166_v40, %v162_v27  ;;  %v335_v51 = vcvt.f32.s32 %v334_v41  ;;  %v343_v52 = vcvt.f32.s32 %v342_v44  ;;  %v146_v53 = vsub.f32 %v138_v45, %v142_v36 }
  0x31   :  { %v190_v30 = vmul.f32 %v81_v2, %v465_v21  ;;  %v351_v54 = vcvt.f32.s32 %v350_v48  ;;  %v198_v56 = vmul.f32 %v122_v31, %v446_v10  ;;  %v206_v57 = vmul.f32 %v96_v5, %v454_v17 }
  0x32   :  { %v178_v55 = vsub.f32 %v170_v50, %v174_v46  ;;  %vm233_vm1 = vcmp.ge.s32.totalorder %v335_v51, 0  ;;  %vm237_vm2 = vcmp.lt.s32.totalorder %v335_v51, 16  ;;  %vm245_vm3 = vcmp.ge.s32.totalorder %v343_v52, 0 }
  0x33   :  { %vm253_vm4 = vcmp.lt.s32.totalorder %v343_v52, 16  ;;  %vm241_vm5 = vmand %vm233_vm1, %vm237_vm2  ;;  %vm261_vm6 = vcmp.ge.s32.totalorder %v351_v54, 0  ;;  %vm269_vm7 = vcmp.lt.s32.totalorder %v351_v54, 16  ;;  %v289_v58 = vmul.u32 256, %v335_v51 }
  0x34   :  { %v293_v59 = vmul.u32 16, %v343_v52  ;;  %vm249_vm8 = vmand %vm241_vm5, %vm245_vm3  ;;  %v154_v60 = vadd.f32 %v150_v49, %v146_v53  ;;  %v186_v61 = vadd.f32 %v182_v47, %v178_v55  ;;  %v194_v0 = vsub.f32 0.0, %v190_v30 }
  0x35   :  { %v214_v1 = vmul.f32 %v110_v23, %v448_v12  ;;  %vm257_vm9 = vmand %vm249_vm8, %vm253_vm4  ;;  %v69_v4 = vsub.f32 0.0, %v485_v35  ;;  %v86_v5 = vmul.f32 %v446_v10, %v451_v15  ;;  %v102_v6 = vmul.f32 %v465_v21, %v451_v15 }
  0x36   :  { %v297_v2 = vadd.s32 %v293_v59, %v289_v58  ;;  %vm265_vm10 = vmand %vm257_vm9, %vm261_vm6  ;;  %v202_v7 = vadd.f32 %v198_v56, %v194_v0  ;;  %v336_v8 = vtrunc.f32 %v154_v60  ;;  %v344_v9 = vtrunc.f32 %v186_v61 }
  0x37   :  { %v120_v13 = vmul.f32 %v454_v17, %v451_v15  ;;  %vm273_vm11 = vmand %vm265_vm10, %vm269_vm7  ;;  %v75_v16 = vsub.f32 %v69_v4, %v463_v20  ;;  %v91_v35 = vadd.f32 %v468_v22, %v86_v5  ;;  %v105_v23 = vadd.f32 %v102_v6, %v457_v18 }
  0x38   :  { %v301_v14 = vadd.s32 %v351_v54, %v297_v2  ;;  %vm285_vm12 = vmand %vm281_vm0, %vm273_vm11  ;;  %v210_v28 = vsub.f32 %v202_v7, %v206_v57  ;;  %v337_v29 = vcvt.f32.s32 %v336_v8  ;;  %v345_v32 = vcvt.f32.s32 %v344_v9 }
  0x39   :  { %vm282_vm13 = vcmp.ne.f32.partialorder %v546_v3, 0.0  ;;  %v123_v33 = vsub.f32 %v488_v37, %v120_v13  ;;  %v82_v15 = vsub.f32 %v75_v16, %v472_v25  ;;  %v97_v34 = vsub.f32 %v91_v35, %v475_v26 }
  0x3a   :  { %v305_v27 = vsel %vm285_vm12, %v301_v14, 4096  ;;  %v111_v20 = vsub.f32 %v105_v23, %v460_v19  ;;  %v218_v22 = vadd.f32 %v214_v1, %v210_v28  ;;  %vm234_vm14 = vcmp.ge.s32.totalorder %v337_v29, 0 }
  0x3b   :  { %309 = vst [vmem:[#allocation7] sm:$0xff] %v305_v27  ;;  %vm238_vm15 = vcmp.lt.s32.totalorder %v337_v29, 16  ;;  %vm246_vm1 = vcmp.ge.s32.totalorder %v345_v32, 0  ;;  %vm254_vm2 = vcmp.lt.s32.totalorder %v345_v32, 16  ;;  %v290_v18 = vmul.u32 256, %v337_v29  ;;  %v279_v27 = vld [vmem:[#allocation6 + $0x10] sm:$0xff] }
  0x3c   :  { %vm242_vm0 = vmand %vm234_vm14, %vm238_vm15  ;;  %v294_v11 = vmul.u32 16, %v345_v32  ;;  %v127_v31 = vmul.f32 %v82_v15, %v448_v12  ;;  %v352_v36 = vtrunc.f32 %v218_v22  ;;  %v135_v37 = vmul.f32 %v97_v34, %v446_v10 }
  0x3d   :  { %vm250_vm3 = vmand %vm242_vm0, %vm246_vm1  ;;  %v143_v25 = vmul.f32 %v111_v20, %v465_v21  ;;  %v151_v26 = vmul.f32 %v123_v33, %v454_v17  ;;  %v159_v41 = vmul.f32 %v82_v15, %v454_v17  ;;  %v167_v44 = vmul.f32 %v111_v20, %v446_v10 }
  0x3e   :  { %v298_v19 = vadd.s32 %v294_v11, %v290_v18  ;;  %v131_v40 = vsub.f32 0.0, %v127_v31  ;;  %v353_v45 = vcvt.f32.s32 %v352_v36  ;;  %vm258_vm4 = vmand %vm250_vm3, %vm254_vm2  ;;  %v175_v47 = vmul.f32 %v123_v33, %v448_v12 }
  0x3f   :  { %v183_v48 = vmul.f32 %v97_v34, %v465_v21  ;;  %v191_v49 = vmul.f32 %v82_v15, %v465_v21  ;;  %v163_v46 = vsub.f32 0.0, %v159_v41  ;;  %v199_v51 = vmul.f32 %v123_v33, %v446_v10 }
  0x40   :  { %v139_v50 = vadd.f32 %v135_v37, %v131_v40  ;;  %v207_v52 = vmul.f32 %v97_v34, %v454_v17  ;;  %vm262_vm5 = vcmp.ge.s32.totalorder %v353_v45, 0  ;;  %vm270_vm6 = vcmp.lt.s32.totalorder %v353_v45, 16 }
  0x41   :  { %v302_v53 = vadd.s32 %v353_v45, %v298_v19  ;;  %v195_v30 = vsub.f32 0.0, %v191_v49  ;;  %vm266_vm7 = vmand %vm258_vm4, %vm262_vm5  ;;  %v171_v55 = vadd.f32 %v167_v44, %v163_v46  ;;  %v215_v56 = vmul.f32 %v111_v20, %v448_v12 }
  0x42   :  { %v147_v54 = vsub.f32 %v139_v50, %v143_v25  ;;  %v76_v57 = vsub.f32 %v69_v4, %v491_v38  ;;  %vm274_vm8 = vmand %vm266_vm7, %vm270_vm6  ;;  %v92_v59 = vadd.f32 %v502_v43, %v86_v5  ;;  %v106_v60 = vadd.f32 %v102_v6, %v520_v62 }
  0x43   :  { %v203_v58 = vadd.f32 %v199_v51, %v195_v30  ;;  %v124_v61 = vsub.f32 %v533_v24, %v120_v13  ;;  %vm286_vm9 = vmand %vm282_vm13, %vm274_vm8  ;;  %v179_v1 = vsub.f32 %v171_v55, %v175_v47  ;;  %vm283_vm3 = vcmp.ne.f32.partialorder %v279_v27, 0.0 }
  0x44   :  { %v155_v0 = vadd.f32 %v151_v26, %v147_v54  ;;  %v83_v2 = vsub.f32 %v76_v57, %v499_v42  ;;  %v306_v7 = vsel %vm286_vm9, %v302_v53, 4096  ;;  %v98_v9 = vsub.f32 %v92_v59, %v494_v39 }
  0x45   :  { %v211_v8 = vsub.f32 %v203_v58, %v207_v52  ;;  %v112_v38 = vsub.f32 %v106_v60, %v523_v63  ;;  %310 = vst [vmem:[#allocation7 + $0x8] sm:$0xff] %v306_v7  ;;  %v187_v4 = vadd.f32 %v183_v48, %v179_v1  ;;  %v152_v24 = vmul.f32 %v124_v61, %v454_v17  ;;  %v280_v52 = vld [vmem:[#allocation6 + $0x18] sm:$0xff] }
  0x46   :  { %v338_v43 = vtrunc.f32 %v155_v0  ;;  %v128_v62 = vmul.f32 %v83_v2, %v448_v12  ;;  %v136_v3 = vmul.f32 %v98_v9, %v446_v10  ;;  %v160_v42 = vmul.f32 %v83_v2, %v454_v17 }
  0x47   :  { %v219_v5 = vadd.f32 %v215_v56, %v211_v8  ;;  %v144_v6 = vmul.f32 %v112_v38, %v465_v21  ;;  %v346_v14 = vtrunc.f32 %v187_v4  ;;  %v168_v39 = vmul.f32 %v112_v38, %v446_v10 }
  0x48   :  { %v339_v13 = vcvt.f32.s32 %v338_v43  ;;  %v132_v16 = vsub.f32 0.0, %v128_v62  ;;  %v164_v35 = vsub.f32 0.0, %v160_v42  ;;  %v176_v23 = vmul.f32 %v124_v61, %v448_v12 }
  0x49   :  { %v354_v63 = vtrunc.f32 %v219_v5  ;;  %v184_v28 = vmul.f32 %v98_v9, %v465_v21  ;;  %v347_v29 = vcvt.f32.s32 %v346_v14  ;;  %v192_v20 = vmul.f32 %v83_v2, %v465_v21 }
  0x4a   :  { %vm235_vm10 = vcmp.ge.s32.totalorder %v339_v13, 0  ;;  %vm239_vm11 = vcmp.lt.s32.totalorder %v339_v13, 16  ;;  %v291_v32 = vmul.u32 256, %v339_v13  ;;  %v140_v15 = vadd.f32 %v136_v3, %v132_v16 }
  0x4b   :  { %v355_v33 = vcvt.f32.s32 %v354_v63  ;;  %vm243_vm12 = vmand %vm235_vm10, %vm239_vm11  ;;  %v172_v34 = vadd.f32 %v168_v39, %v164_v35  ;;  %vm247_vm13 = vcmp.ge.s32.totalorder %v347_v29, 0  ;;  %vm255_vm14 = vcmp.lt.s32.totalorder %v347_v29, 16 }
  0x4c   :  { %v295_v22 = vmul.u32 16, %v347_v29  ;;  %v200_v18 = vmul.f32 %v124_v61, %v446_v10  ;;  %vm251_vm15 = vmand %vm243_vm12, %vm247_vm13  ;;  %v148_v11 = vsub.f32 %v140_v15, %v144_v6  ;;  %v196_v37 = vsub.f32 0.0, %v192_v20 }
  0x4d   :  { %vm263_vm1 = vcmp.ge.s32.totalorder %v355_v33, 0  ;;  %vm271_vm0 = vcmp.lt.s32.totalorder %v355_v33, 16  ;;  %v180_v31 = vsub.f32 %v172_v34, %v176_v23  ;;  %vm259_vm2 = vmand %vm251_vm15, %vm255_vm14  ;;  %v208_v25 = vmul.f32 %v98_v9, %v454_v17 }
  0x4e   :  { %v299_v36 = vadd.s32 %v295_v22, %v291_v32  ;;  %vm267_vm4 = vmand %vm259_vm2, %vm263_vm1  ;;  %v156_v26 = vadd.f32 %v152_v24, %v148_v11  ;;  %v204_v40 = vadd.f32 %v200_v18, %v196_v37  ;;  %v216_v41 = vmul.f32 %v112_v38, %v448_v12 }
  0x4f   :  { %v188_v19 = vadd.f32 %v184_v28, %v180_v31  ;;  %vm275_vm5 = vmand %vm267_vm4, %vm271_vm0  ;;  %vm284_vm1 = vcmp.ne.f32.partialorder %v280_v52, 0.0 }
  0x50   :  { %v303_v21 = vadd.s32 %v355_v33, %v299_v36  ;;  %vm287_vm6 = vmand %vm283_vm3, %vm275_vm5  ;;  %v340_v10 = vtrunc.f32 %v156_v26  ;;  %v212_v47 = vsub.f32 %v204_v40, %v208_v25 }
  0x51   :  { %v348_v44 = vtrunc.f32 %v188_v19 }
  0x52   :  { %v307_v45 = vsel %vm287_vm6, %v303_v21, 4096  ;;  %v341_v48 = vcvt.f32.s32 %v340_v10  ;;  %v220_v50 = vadd.f32 %v216_v41, %v212_v47 }
  0x53   :  { %311 = vst [vmem:[#allocation7 + $0x10] sm:$0xff] %v307_v45  ;;  %v349_v49 = vcvt.f32.s32 %v348_v44 }
  0x54   :  { %vm236_vm7 = vcmp.ge.s32.totalorder %v341_v48, 0  ;;  %vm240_vm8 = vcmp.lt.s32.totalorder %v341_v48, 16  ;;  %v356_v17 = vtrunc.f32 %v220_v50  ;;  %v292_v46 = vmul.u32 256, %v341_v48 }
  0x55   :  { %vm248_vm9 = vcmp.ge.s32.totalorder %v349_v49, 0  ;;  %vm256_vm10 = vcmp.lt.s32.totalorder %v349_v49, 16  ;;  %vm244_vm11 = vmand %vm236_vm7, %vm240_vm8  ;;  %v296_v51 = vmul.u32 16, %v349_v49 }
  0x56   :  { %vm252_vm12 = vmand %vm244_vm11, %vm248_vm9  ;;  %v357_v12 = vcvt.f32.s32 %v356_v17 }
  0x57   :  { %vm260_vm13 = vmand %vm252_vm12, %vm256_vm10  ;;  %v300_v53 = vadd.s32 %v296_v51, %v292_v46 }
  0x58   :  { %vm264_vm14 = vcmp.ge.s32.totalorder %v357_v12, 0  ;;  %vm272_vm15 = vcmp.lt.s32.totalorder %v357_v12, 16 }
  0x59   :  { %v304_v30 = vadd.s32 %v357_v12, %v300_v53  ;;  %vm268_vm0 = vmand %vm260_vm13, %vm264_vm14 }
  0x5a   :  { %vm276_vm2 = vmand %vm268_vm0, %vm272_vm15 }
  0x5b   :  { %vm288_vm3 = vmand %vm284_vm1, %vm276_vm2 }
  0x5c   :  { %v308_v54 = vsel %vm288_vm3, %v304_v30, 4096 }
  0x5d   :  { %312 = vst [vmem:[#allocation7 + $0x18] sm:$0xff] %v308_v54 }
  0x5e   :  { %402 = shalt.err (!%p399_p9)
}
  0x5f   :  { %324 = dma.vmem_to_hbm [thread:$0]  %s319_s22, 512, %s607_s2, [#allocation4], %s419_s15, %s419_s15, %s420_s16  }
  0x60   :  { %415 = dma.done.wait [#allocation4], 512  }
  0x61   :  { %416 = vsyncadd [#allocation4], 4294966784 }
  0x62   :  { %328 = vsyncpa [#allocation3], 1 }
  0x63   :  { %329 = vsyncpa [#allocation4], 1 }
  0x64   :  { %330 = vsyncpa [#allocation5], 1 }

</bundles_post_ra>
